<compile_context>
chip_gen: v7x
topology: tpu7x:2x2x1
jax: 0.10.0
libtpu: 0.0.40
codegen_flags: <defaults>
</compile_context>

<pallas_src>
import functools

import jax
import jax.numpy as jnp
from jax.experimental import pallas as pl
from jax.experimental.pallas import tpu as pltpu  # noqa: F401  (TPU backend)


def lstm_kernel(gx_ref, mask_ref, wh_ref, wfc_ref, bfc_ref, logits_ref, rep_ref):
    """Pure-recurrence kernel; the whole (small) problem lives in VMEM.

    gx_ref    : (L, B, 4H) f32   time-major input projection, gate order [f|i|o|g]
    mask_ref  : (L, B, 1)  f32   time-major padding mask
    wh_ref    : (H, 4H)    bf16  hidden->gates weights, same gate order
    wfc_ref   : (H, P)     bf16  classifier weights, zero-padded to P lanes
    bfc_ref   : (1, P)     f32   classifier bias, zero-padded
    logits_ref: (B, P)     f32   output (lanes [0, C) hold the real logits)
    rep_ref   : (B, H)     f32   output (masked-mean pooled representation)
    """
    L, B, G = gx_ref.shape
    H = G // 4

    # Hoisted once (JAX does not CSE broadcast_in_dim — keep it out of the loop).
    wh = wh_ref[...]                                              # (H, 4H) bf16
    lane = jax.lax.broadcasted_iota(jnp.int32, (B, G), 1)
    sig_sel = lane < 3 * H                                        # f, i, o lanes

    h = jnp.zeros((B, H), jnp.float32)
    c = jnp.zeros((B, H), jnp.float32)
    hsum = jnp.zeros((B, H), jnp.float32)
    msum = jnp.zeros((B, 1), jnp.float32)

    # Recurrence: fully unrolled (L static).  Per step: ONE lane-dense MXU op,
    # two full-vreg EUP activations + one small tanh, all-VPU gate math.
    for t in range(L):
        z = gx_ref[t] + jnp.dot(h.astype(jnp.bfloat16), wh,
                                preferred_element_type=jnp.float32)   # (B, 4H)
        act = jnp.where(sig_sel, jax.nn.sigmoid(z), jnp.tanh(z))      # lane select
        f = act[:, 0 * H:1 * H]
        i = act[:, 1 * H:2 * H]
        o = act[:, 2 * H:3 * H]
        g = act[:, 3 * H:4 * H]
        c = f * c + i * g                 # torch's c-mask line is a no-op; c stays unmasked
        h_new = o * jnp.tanh(c)
        m = mask_ref[t]                   # (B, 1); lane-broadcast on the VPU below
        h = h + m * (h_new - h)           # h_new where real token, keep h where pad
        hsum = hsum + m * h               # == all_hidden[t] * mask[t] in torch
        msum = msum + m

    # Masked mean pooling (exact divide, one-shot) + bf16 classifier matmul.
    rep = hsum / jnp.maximum(msum, 1e-9)
    logits_ref[...] = (jnp.dot(rep.astype(jnp.bfloat16), wfc_ref[...],
                               preferred_element_type=jnp.float32)
                       + bfc_ref[...])                            # lane-dense (B, P) store
    rep_ref[...] = rep


def manual_lstm_forward(x_ids, mask_bool, params):
    """Glue: embedding gather + hoisted input projection, then the Pallas kernel."""
    embed_table = params["embed"]
    wx, wh, b = params["wx"], params["wh"], params["b"]
    wfc, bfc = params["wfc"], params["bfc"]

    B, L = x_ids.shape
    H = wh.shape[0]
    C = wfc.shape[1]
    P = 128 * pl.cdiv(C, 128)             # lane-dense logits slab width

    # Gather embeddings directly in time-major order (no (B, L, E) transpose).
    emb_tm = jnp.take(embed_table, x_ids.T, axis=0)               # (L, B, E) f32
    # Hoisted input projection as a plain XLA matmul (kept out of the kernel so
    # the kernel is a pure recurrence and never slices gate lanes of gx).
    gx = jnp.einsum("lbe,eg->lbg", emb_tm, wx) + b                # (L, B, 4H) f32

    # Slim time-major mask; broadcast over H happens inside the kernel.
    mask_tm = mask_bool.T.astype(jnp.float32)[:, :, None]         # (L, B, 1)

    wfc_pad = jnp.pad(wfc, ((0, 0), (0, P - C))).astype(jnp.bfloat16)
    bfc_pad = jnp.pad(bfc, ((0, 0), (0, P - C)))

    logits_pad, rep = pl.pallas_call(
        lstm_kernel,
        out_shape=(
            jax.ShapeDtypeStruct((B, P), jnp.float32),
            jax.ShapeDtypeStruct((B, H), jnp.float32),
        ),
    )(gx, mask_tm, wh.astype(jnp.bfloat16), wfc_pad, bfc_pad)
    return logits_pad[:, :C], rep


def xavier_uniform(key, shape):
    """torch.nn.init.xavier_uniform_ for 2-D weights of shape (out, in)."""
    fan_out, fan_in = shape
    a = jnp.sqrt(6.0 / (fan_in + fan_out))
    return jax.random.uniform(key, shape, jnp.float32, -a, a)


def init_params(key, vocab_size, embed_dim, hidden_dim, num_classes, pad_idx=0):
    ks = jax.random.split(key, 6)
    embed = xavier_uniform(ks[0], (vocab_size, embed_dim))
    # (torch's _init_weights xavier-inits the embedding too; the padding row is
    #  NOT re-zeroed afterwards, so we keep it as-is.)

    # Per-gate torch Linear weights have shape (H, E+H); columns [:E] act on
    # x_t, columns [E:] act on h.
    inp = embed_dim + hidden_dim
    w_f = xavier_uniform(ks[1], (hidden_dim, inp))
    w_i = xavier_uniform(ks[2], (hidden_dim, inp))
    w_c = xavier_uniform(ks[3], (hidden_dim, inp))
    w_o = xavier_uniform(ks[4], (hidden_dim, inp))

    # Gate column order [f | i | o | g]: sigmoid gates in lanes [0, 3H),
    # tanh gate in lanes [3H, 4H) -> single lane-iota activation select.
    gates = (w_f, w_i, w_o, w_c)
    wx = jnp.concatenate([w[:, :embed_dim].T for w in gates], axis=1)   # (E, 4H)
    wh = jnp.concatenate([w[:, embed_dim:].T for w in gates], axis=1)   # (H, 4H)
    b = jnp.zeros((1, 4 * hidden_dim), jnp.float32)                     # biases -> 0

    fc_w = xavier_uniform(ks[5], (num_classes, hidden_dim))
    wfc = fc_w.T                                                        # (H, C)
    bfc = jnp.zeros((1, num_classes), jnp.float32)

    return {"embed": embed, "wx": wx, "wh": wh, "b": b, "wfc": wfc, "bfc": bfc}


if __name__ == "__main__":
    VOCAB, EMBED, HIDDEN, CLASSES = 50, 16, 32, 4
    B, L = 8, 8
    PAD_IDX = 0

    key = jax.random.PRNGKey(0)
    k_param, k_ids, k_len = jax.random.split(key, 3)

    params = init_params(k_param, VOCAB, EMBED, HIDDEN, CLASSES, PAD_IDX)

    # Token ids with variable lengths (padding at the tail with pad_idx=0).
    lengths = jax.random.randint(k_len, (B,), 3, L + 1)                # in [3, L]
    pos = jnp.arange(L)[None, :]
    mask = pos < lengths[:, None]                                      # (B, L) bool
    x_ids = jax.random.randint(k_ids, (B, L), 1, VOCAB)                # non-pad tokens
    x_ids = jnp.where(mask, x_ids, PAD_IDX).astype(jnp.int32)

    logits, rep = jax.jit(functools.partial(manual_lstm_forward, params=params))(x_ids, mask)
    jax.block_until_ready((logits, rep))

    assert logits.shape == (B, CLASSES) and rep.shape == (B, HIDDEN)
    assert bool(jnp.all(jnp.isfinite(logits))) and bool(jnp.all(jnp.isfinite(rep)))
    print("KERNEL_OK")
</pallas_src>

<mosaic_0001>
module attributes {stable_mosaic.version = 11 : i64} {
  func.func @lstm_kernel(%arg0: memref<8x8x128xf32, #tpu.memory_space<vmem>>, %arg1: memref<8x8x1xf32, #tpu.memory_space<vmem>>, %arg2: memref<32x128xbf16, #tpu.memory_space<vmem>>, %arg3: memref<32x128xbf16, #tpu.memory_space<vmem>>, %arg4: memref<1x128xf32, #tpu.memory_space<vmem>>, %arg5: memref<8x128xf32, #tpu.memory_space<vmem>>, %arg6: memref<8x32xf32, #tpu.memory_space<vmem>>) attributes {dimension_semantics = [], scalar_prefetch = 0 : i64, scratch_operands = 0 : i64, tpu.core_type = #tpu.core_type<tc>} {
    %c0 = arith.constant 0 : index
    %c0_0 = arith.constant 0 : index
    %0 = vector.load %arg2[%c0, %c0_0] : memref<32x128xbf16, #tpu.memory_space<vmem>>, vector<32x128xbf16>
    %1 = tpu.iota {dimensions = array<i32: 1>} : vector<8x128xi32>
    %c96_i32 = arith.constant 96 : i32
    %2 = vector.broadcast %c96_i32 : i32 to vector<8x128xi32>
    %3 = arith.cmpi slt, %1, %2 : vector<8x128xi32>
    %cst = arith.constant 0.000000e+00 : f32
    %4 = vector.broadcast %cst : f32 to vector<8x32xf32>
    %cst_1 = arith.constant 0.000000e+00 : f32
    %5 = vector.broadcast %cst_1 : f32 to vector<8x32xf32>
    %cst_2 = arith.constant 0.000000e+00 : f32
    %6 = vector.broadcast %cst_2 : f32 to vector<8x32xf32>
    %cst_3 = arith.constant 0.000000e+00 : f32
    %7 = vector.broadcast %cst_3 : f32 to vector<8x1xf32>
    %c0_4 = arith.constant 0 : index
    %c0_5 = arith.constant 0 : index
    %c0_6 = arith.constant 0 : index
    %8 = vector.load %arg0[%c0_4, %c0_5, %c0_6] : memref<8x8x128xf32, #tpu.memory_space<vmem>>, vector<1x8x128xf32>
    %9 = vector.shape_cast %8 : vector<1x8x128xf32> to vector<8x128xf32>
    %10 = arith.truncf %4 : vector<8x32xf32> to vector<8x32xbf16>
    %cst_7 = arith.constant dense<0.000000e+00> : vector<8x128xf32>
    %11 = tpu.matmul %10, %0, %cst_7 {dimension_numbers = #tpu.dot_dimension_numbers<[1], [0], [0], [1], [0, 0, 1, 1], [], []>} : vector<8x32xbf16>, vector<32x128xbf16>, vector<8x128xf32> -> vector<8x128xf32>
    %12 = arith.addf %9, %11 : vector<8x128xf32>
    %13 = arith.negf %12 : vector<8x128xf32>
    %14 = math.exp %13 : vector<8x128xf32>
    %cst_8 = arith.constant 1.000000e+00 : f32
    %15 = vector.broadcast %cst_8 : f32 to vector<8x128xf32>
    %16 = arith.addf %15, %14 : vector<8x128xf32>
    %17 = arith.divf %15, %16 : vector<8x128xf32>
    %18 = math.tanh %12 : vector<8x128xf32>
    %19 = arith.select %3, %17, %18 : vector<8x128xi1>, vector<8x128xf32>
    %20 = vector.extract_strided_slice %19 {offsets = [0, 0], sizes = [8, 32], strides = [1, 1]} : vector<8x128xf32> to vector<8x32xf32>
    %21 = vector.extract_strided_slice %19 {offsets = [0, 32], sizes = [8, 32], strides = [1, 1]} : vector<8x128xf32> to vector<8x32xf32>
    %22 = vector.extract_strided_slice %19 {offsets = [0, 64], sizes = [8, 32], strides = [1, 1]} : vector<8x128xf32> to vector<8x32xf32>
    %23 = vector.extract_strided_slice %19 {offsets = [0, 96], sizes = [8, 32], strides = [1, 1]} : vector<8x128xf32> to vector<8x32xf32>
    %24 = arith.mulf %20, %5 : vector<8x32xf32>
    %25 = arith.mulf %21, %23 : vector<8x32xf32>
    %26 = arith.addf %24, %25 : vector<8x32xf32>
    %27 = math.tanh %26 : vector<8x32xf32>
    %28 = arith.mulf %22, %27 : vector<8x32xf32>
    %c0_9 = arith.constant 0 : index
    %c0_10 = arith.constant 0 : index
    %c0_11 = arith.constant 0 : index
    %29 = vector.load %arg1[%c0_9, %c0_10, %c0_11] : memref<8x8x1xf32, #tpu.memory_space<vmem>>, vector<1x8x1xf32>
    %30 = vector.shape_cast %29 : vector<1x8x1xf32> to vector<8x1xf32>
    %31 = arith.subf %28, %4 : vector<8x32xf32>
    %32 = vector.broadcast %30 : vector<8x1xf32> to vector<8x32xf32>
    %33 = arith.mulf %32, %31 : vector<8x32xf32>
    %34 = arith.addf %4, %33 : vector<8x32xf32>
    %35 = vector.broadcast %30 : vector<8x1xf32> to vector<8x32xf32>
    %36 = arith.mulf %35, %34 : vector<8x32xf32>
    %37 = arith.addf %6, %36 : vector<8x32xf32>
    %38 = arith.addf %7, %30 : vector<8x1xf32>
    %c1 = arith.constant 1 : index
    %c0_12 = arith.constant 0 : index
    %c0_13 = arith.constant 0 : index
    %39 = vector.load %arg0[%c1, %c0_12, %c0_13] : memref<8x8x128xf32, #tpu.memory_space<vmem>>, vector<1x8x128xf32>
    %40 = vector.shape_cast %39 : vector<1x8x128xf32> to vector<8x128xf32>
    %41 = arith.truncf %34 : vector<8x32xf32> to vector<8x32xbf16>
    %cst_14 = arith.constant dense<0.000000e+00> : vector<8x128xf32>
    %42 = tpu.matmul %41, %0, %cst_14 {dimension_numbers = #tpu.dot_dimension_numbers<[1], [0], [0], [1], [0, 0, 1, 1], [], []>} : vector<8x32xbf16>, vector<32x128xbf16>, vector<8x128xf32> -> vector<8x128xf32>
    %43 = arith.addf %40, %42 : vector<8x128xf32>
    %44 = arith.negf %43 : vector<8x128xf32>
    %45 = math.exp %44 : vector<8x128xf32>
    %cst_15 = arith.constant 1.000000e+00 : f32
    %46 = vector.broadcast %cst_15 : f32 to vector<8x128xf32>
    %47 = arith.addf %46, %45 : vector<8x128xf32>
    %48 = arith.divf %46, %47 : vector<8x128xf32>
    %49 = math.tanh %43 : vector<8x128xf32>
    %50 = arith.select %3, %48, %49 : vector<8x128xi1>, vector<8x128xf32>
    %51 = vector.extract_strided_slice %50 {offsets = [0, 0], sizes = [8, 32], strides = [1, 1]} : vector<8x128xf32> to vector<8x32xf32>
    %52 = vector.extract_strided_slice %50 {offsets = [0, 32], sizes = [8, 32], strides = [1, 1]} : vector<8x128xf32> to vector<8x32xf32>
    %53 = vector.extract_strided_slice %50 {offsets = [0, 64], sizes = [8, 32], strides = [1, 1]} : vector<8x128xf32> to vector<8x32xf32>
    %54 = vector.extract_strided_slice %50 {offsets = [0, 96], sizes = [8, 32], strides = [1, 1]} : vector<8x128xf32> to vector<8x32xf32>
    %55 = arith.mulf %51, %26 : vector<8x32xf32>
    %56 = arith.mulf %52, %54 : vector<8x32xf32>
    %57 = arith.addf %55, %56 : vector<8x32xf32>
    %58 = math.tanh %57 : vector<8x32xf32>
    %59 = arith.mulf %53, %58 : vector<8x32xf32>
    %c1_16 = arith.constant 1 : index
    %c0_17 = arith.constant 0 : index
    %c0_18 = arith.constant 0 : index
    %60 = vector.load %arg1[%c1_16, %c0_17, %c0_18] : memref<8x8x1xf32, #tpu.memory_space<vmem>>, vector<1x8x1xf32>
    %61 = vector.shape_cast %60 : vector<1x8x1xf32> to vector<8x1xf32>
    %62 = arith.subf %59, %34 : vector<8x32xf32>
    %63 = vector.broadcast %61 : vector<8x1xf32> to vector<8x32xf32>
    %64 = arith.mulf %63, %62 : vector<8x32xf32>
    %65 = arith.addf %34, %64 : vector<8x32xf32>
    %66 = vector.broadcast %61 : vector<8x1xf32> to vector<8x32xf32>
    %67 = arith.mulf %66, %65 : vector<8x32xf32>
    %68 = arith.addf %37, %67 : vector<8x32xf32>
    %69 = arith.addf %38, %61 : vector<8x1xf32>
    %c2 = arith.constant 2 : index
    %c0_19 = arith.constant 0 : index
    %c0_20 = arith.constant 0 : index
    %70 = vector.load %arg0[%c2, %c0_19, %c0_20] : memref<8x8x128xf32, #tpu.memory_space<vmem>>, vector<1x8x128xf32>
    %71 = vector.shape_cast %70 : vector<1x8x128xf32> to vector<8x128xf32>
    %72 = arith.truncf %65 : vector<8x32xf32> to vector<8x32xbf16>
    %cst_21 = arith.constant dense<0.000000e+00> : vector<8x128xf32>
    %73 = tpu.matmul %72, %0, %cst_21 {dimension_numbers = #tpu.dot_dimension_numbers<[1], [0], [0], [1], [0, 0, 1, 1], [], []>} : vector<8x32xbf16>, vector<32x128xbf16>, vector<8x128xf32> -> vector<8x128xf32>
    %74 = arith.addf %71, %73 : vector<8x128xf32>
    %75 = arith.negf %74 : vector<8x128xf32>
    %76 = math.exp %75 : vector<8x128xf32>
    %cst_22 = arith.constant 1.000000e+00 : f32
    %77 = vector.broadcast %cst_22 : f32 to vector<8x128xf32>
    %78 = arith.addf %77, %76 : vector<8x128xf32>
    %79 = arith.divf %77, %78 : vector<8x128xf32>
    %80 = math.tanh %74 : vector<8x128xf32>
    %81 = arith.select %3, %79, %80 : vector<8x128xi1>, vector<8x128xf32>
    %82 = vector.extract_strided_slice %81 {offsets = [0, 0], sizes = [8, 32], strides = [1, 1]} : vector<8x128xf32> to vector<8x32xf32>
    %83 = vector.extract_strided_slice %81 {offsets = [0, 32], sizes = [8, 32], strides = [1, 1]} : vector<8x128xf32> to vector<8x32xf32>
    %84 = vector.extract_strided_slice %81 {offsets = [0, 64], sizes = [8, 32], strides = [1, 1]} : vector<8x128xf32> to vector<8x32xf32>
    %85 = vector.extract_strided_slice %81 {offsets = [0, 96], sizes = [8, 32], strides = [1, 1]} : vector<8x128xf32> to vector<8x32xf32>
    %86 = arith.mulf %82, %57 : vector<8x32xf32>
    %87 = arith.mulf %83, %85 : vector<8x32xf32>
    %88 = arith.addf %86, %87 : vector<8x32xf32>
    %89 = math.tanh %88 : vector<8x32xf32>
    %90 = arith.mulf %84, %89 : vector<8x32xf32>
    %c2_23 = arith.constant 2 : index
    %c0_24 = arith.constant 0 : index
    %c0_25 = arith.constant 0 : index
    %91 = vector.load %arg1[%c2_23, %c0_24, %c0_25] : memref<8x8x1xf32, #tpu.memory_space<vmem>>, vector<1x8x1xf32>
    %92 = vector.shape_cast %91 : vector<1x8x1xf32> to vector<8x1xf32>
    %93 = arith.subf %90, %65 : vector<8x32xf32>
    %94 = vector.broadcast %92 : vector<8x1xf32> to vector<8x32xf32>
    %95 = arith.mulf %94, %93 : vector<8x32xf32>
    %96 = arith.addf %65, %95 : vector<8x32xf32>
    %97 = vector.broadcast %92 : vector<8x1xf32> to vector<8x32xf32>
    %98 = arith.mulf %97, %96 : vector<8x32xf32>
    %99 = arith.addf %68, %98 : vector<8x32xf32>
    %100 = arith.addf %69, %92 : vector<8x1xf32>
    %c3 = arith.constant 3 : index
    %c0_26 = arith.constant 0 : index
    %c0_27 = arith.constant 0 : index
    %101 = vector.load %arg0[%c3, %c0_26, %c0_27] : memref<8x8x128xf32, #tpu.memory_space<vmem>>, vector<1x8x128xf32>
    %102 = vector.shape_cast %101 : vector<1x8x128xf32> to vector<8x128xf32>
    %103 = arith.truncf %96 : vector<8x32xf32> to vector<8x32xbf16>
    %cst_28 = arith.constant dense<0.000000e+00> : vector<8x128xf32>
    %104 = tpu.matmul %103, %0, %cst_28 {dimension_numbers = #tpu.dot_dimension_numbers<[1], [0], [0], [1], [0, 0, 1, 1], [], []>} : vector<8x32xbf16>, vector<32x128xbf16>, vector<8x128xf32> -> vector<8x128xf32>
    %105 = arith.addf %102, %104 : vector<8x128xf32>
    %106 = arith.negf %105 : vector<8x128xf32>
    %107 = math.exp %106 : vector<8x128xf32>
    %cst_29 = arith.constant 1.000000e+00 : f32
    %108 = vector.broadcast %cst_29 : f32 to vector<8x128xf32>
    %109 = arith.addf %108, %107 : vector<8x128xf32>
    %110 = arith.divf %108, %109 : vector<8x128xf32>
    %111 = math.tanh %105 : vector<8x128xf32>
    %112 = arith.select %3, %110, %111 : vector<8x128xi1>, vector<8x128xf32>
    %113 = vector.extract_strided_slice %112 {offsets = [0, 0], sizes = [8, 32], strides = [1, 1]} : vector<8x128xf32> to vector<8x32xf32>
    %114 = vector.extract_strided_slice %112 {offsets = [0, 32], sizes = [8, 32], strides = [1, 1]} : vector<8x128xf32> to vector<8x32xf32>
    %115 = vector.extract_strided_slice %112 {offsets = [0, 64], sizes = [8, 32], strides = [1, 1]} : vector<8x128xf32> to vector<8x32xf32>
    %116 = vector.extract_strided_slice %112 {offsets = [0, 96], sizes = [8, 32], strides = [1, 1]} : vector<8x128xf32> to vector<8x32xf32>
    %117 = arith.mulf %113, %88 : vector<8x32xf32>
    %118 = arith.mulf %114, %116 : vector<8x32xf32>
    %119 = arith.addf %117, %118 : vector<8x32xf32>
    %120 = math.tanh %119 : vector<8x32xf32>
    %121 = arith.mulf %115, %120 : vector<8x32xf32>
    %c3_30 = arith.constant 3 : index
    %c0_31 = arith.constant 0 : index
    %c0_32 = arith.constant 0 : index
    %122 = vector.load %arg1[%c3_30, %c0_31, %c0_32] : memref<8x8x1xf32, #tpu.memory_space<vmem>>, vector<1x8x1xf32>
    %123 = vector.shape_cast %122 : vector<1x8x1xf32> to vector<8x1xf32>
    %124 = arith.subf %121, %96 : vector<8x32xf32>
    %125 = vector.broadcast %123 : vector<8x1xf32> to vector<8x32xf32>
    %126 = arith.mulf %125, %124 : vector<8x32xf32>
    %127 = arith.addf %96, %126 : vector<8x32xf32>
    %128 = vector.broadcast %123 : vector<8x1xf32> to vector<8x32xf32>
    %129 = arith.mulf %128, %127 : vector<8x32xf32>
    %130 = arith.addf %99, %129 : vector<8x32xf32>
    %131 = arith.addf %100, %123 : vector<8x1xf32>
    %c4 = arith.constant 4 : index
    %c0_33 = arith.constant 0 : index
    %c0_34 = arith.constant 0 : index
    %132 = vector.load %arg0[%c4, %c0_33, %c0_34] : memref<8x8x128xf32, #tpu.memory_space<vmem>>, vector<1x8x128xf32>
    %133 = vector.shape_cast %132 : vector<1x8x128xf32> to vector<8x128xf32>
    %134 = arith.truncf %127 : vector<8x32xf32> to vector<8x32xbf16>
    %cst_35 = arith.constant dense<0.000000e+00> : vector<8x128xf32>
    %135 = tpu.matmul %134, %0, %cst_35 {dimension_numbers = #tpu.dot_dimension_numbers<[1], [0], [0], [1], [0, 0, 1, 1], [], []>} : vector<8x32xbf16>, vector<32x128xbf16>, vector<8x128xf32> -> vector<8x128xf32>
    %136 = arith.addf %133, %135 : vector<8x128xf32>
    %137 = arith.negf %136 : vector<8x128xf32>
    %138 = math.exp %137 : vector<8x128xf32>
    %cst_36 = arith.constant 1.000000e+00 : f32
    %139 = vector.broadcast %cst_36 : f32 to vector<8x128xf32>
    %140 = arith.addf %139, %138 : vector<8x128xf32>
    %141 = arith.divf %139, %140 : vector<8x128xf32>
    %142 = math.tanh %136 : vector<8x128xf32>
    %143 = arith.select %3, %141, %142 : vector<8x128xi1>, vector<8x128xf32>
    %144 = vector.extract_strided_slice %143 {offsets = [0, 0], sizes = [8, 32], strides = [1, 1]} : vector<8x128xf32> to vector<8x32xf32>
    %145 = vector.extract_strided_slice %143 {offsets = [0, 32], sizes = [8, 32], strides = [1, 1]} : vector<8x128xf32> to vector<8x32xf32>
    %146 = vector.extract_strided_slice %143 {offsets = [0, 64], sizes = [8, 32], strides = [1, 1]} : vector<8x128xf32> to vector<8x32xf32>
    %147 = vector.extract_strided_slice %143 {offsets = [0, 96], sizes = [8, 32], strides = [1, 1]} : vector<8x128xf32> to vector<8x32xf32>
    %148 = arith.mulf %144, %119 : vector<8x32xf32>
    %149 = arith.mulf %145, %147 : vector<8x32xf32>
    %150 = arith.addf %148, %149 : vector<8x32xf32>
    %151 = math.tanh %150 : vector<8x32xf32>
    %152 = arith.mulf %146, %151 : vector<8x32xf32>
    %c4_37 = arith.constant 4 : index
    %c0_38 = arith.constant 0 : index
    %c0_39 = arith.constant 0 : index
    %153 = vector.load %arg1[%c4_37, %c0_38, %c0_39] : memref<8x8x1xf32, #tpu.memory_space<vmem>>, vector<1x8x1xf32>
    %154 = vector.shape_cast %153 : vector<1x8x1xf32> to vector<8x1xf32>
    %155 = arith.subf %152, %127 : vector<8x32xf32>
    %156 = vector.broadcast %154 : vector<8x1xf32> to vector<8x32xf32>
    %157 = arith.mulf %156, %155 : vector<8x32xf32>
    %158 = arith.addf %127, %157 : vector<8x32xf32>
    %159 = vector.broadcast %154 : vector<8x1xf32> to vector<8x32xf32>
    %160 = arith.mulf %159, %158 : vector<8x32xf32>
    %161 = arith.addf %130, %160 : vector<8x32xf32>
    %162 = arith.addf %131, %154 : vector<8x1xf32>
    %c5 = arith.constant 5 : index
    %c0_40 = arith.constant 0 : index
    %c0_41 = arith.constant 0 : index
    %163 = vector.load %arg0[%c5, %c0_40, %c0_41] : memref<8x8x128xf32, #tpu.memory_space<vmem>>, vector<1x8x128xf32>
    %164 = vector.shape_cast %163 : vector<1x8x128xf32> to vector<8x128xf32>
    %165 = arith.truncf %158 : vector<8x32xf32> to vector<8x32xbf16>
    %cst_42 = arith.constant dense<0.000000e+00> : vector<8x128xf32>
    %166 = tpu.matmul %165, %0, %cst_42 {dimension_numbers = #tpu.dot_dimension_numbers<[1], [0], [0], [1], [0, 0, 1, 1], [], []>} : vector<8x32xbf16>, vector<32x128xbf16>, vector<8x128xf32> -> vector<8x128xf32>
    %167 = arith.addf %164, %166 : vector<8x128xf32>
    %168 = arith.negf %167 : vector<8x128xf32>
    %169 = math.exp %168 : vector<8x128xf32>
    %cst_43 = arith.constant 1.000000e+00 : f32
    %170 = vector.broadcast %cst_43 : f32 to vector<8x128xf32>
    %171 = arith.addf %170, %169 : vector<8x128xf32>
    %172 = arith.divf %170, %171 : vector<8x128xf32>
    %173 = math.tanh %167 : vector<8x128xf32>
    %174 = arith.select %3, %172, %173 : vector<8x128xi1>, vector<8x128xf32>
    %175 = vector.extract_strided_slice %174 {offsets = [0, 0], sizes = [8, 32], strides = [1, 1]} : vector<8x128xf32> to vector<8x32xf32>
    %176 = vector.extract_strided_slice %174 {offsets = [0, 32], sizes = [8, 32], strides = [1, 1]} : vector<8x128xf32> to vector<8x32xf32>
    %177 = vector.extract_strided_slice %174 {offsets = [0, 64], sizes = [8, 32], strides = [1, 1]} : vector<8x128xf32> to vector<8x32xf32>
    %178 = vector.extract_strided_slice %174 {offsets = [0, 96], sizes = [8, 32], strides = [1, 1]} : vector<8x128xf32> to vector<8x32xf32>
    %179 = arith.mulf %175, %150 : vector<8x32xf32>
    %180 = arith.mulf %176, %178 : vector<8x32xf32>
    %181 = arith.addf %179, %180 : vector<8x32xf32>
    %182 = math.tanh %181 : vector<8x32xf32>
    %183 = arith.mulf %177, %182 : vector<8x32xf32>
    %c5_44 = arith.constant 5 : index
    %c0_45 = arith.constant 0 : index
    %c0_46 = arith.constant 0 : index
    %184 = vector.load %arg1[%c5_44, %c0_45, %c0_46] : memref<8x8x1xf32, #tpu.memory_space<vmem>>, vector<1x8x1xf32>
    %185 = vector.shape_cast %184 : vector<1x8x1xf32> to vector<8x1xf32>
    %186 = arith.subf %183, %158 : vector<8x32xf32>
    %187 = vector.broadcast %185 : vector<8x1xf32> to vector<8x32xf32>
    %188 = arith.mulf %187, %186 : vector<8x32xf32>
    %189 = arith.addf %158, %188 : vector<8x32xf32>
    %190 = vector.broadcast %185 : vector<8x1xf32> to vector<8x32xf32>
    %191 = arith.mulf %190, %189 : vector<8x32xf32>
    %192 = arith.addf %161, %191 : vector<8x32xf32>
    %193 = arith.addf %162, %185 : vector<8x1xf32>
    %c6 = arith.constant 6 : index
    %c0_47 = arith.constant 0 : index
    %c0_48 = arith.constant 0 : index
    %194 = vector.load %arg0[%c6, %c0_47, %c0_48] : memref<8x8x128xf32, #tpu.memory_space<vmem>>, vector<1x8x128xf32>
    %195 = vector.shape_cast %194 : vector<1x8x128xf32> to vector<8x128xf32>
    %196 = arith.truncf %189 : vector<8x32xf32> to vector<8x32xbf16>
    %cst_49 = arith.constant dense<0.000000e+00> : vector<8x128xf32>
    %197 = tpu.matmul %196, %0, %cst_49 {dimension_numbers = #tpu.dot_dimension_numbers<[1], [0], [0], [1], [0, 0, 1, 1], [], []>} : vector<8x32xbf16>, vector<32x128xbf16>, vector<8x128xf32> -> vector<8x128xf32>
    %198 = arith.addf %195, %197 : vector<8x128xf32>
    %199 = arith.negf %198 : vector<8x128xf32>
    %200 = math.exp %199 : vector<8x128xf32>
    %cst_50 = arith.constant 1.000000e+00 : f32
    %201 = vector.broadcast %cst_50 : f32 to vector<8x128xf32>
    %202 = arith.addf %201, %200 : vector<8x128xf32>
    %203 = arith.divf %201, %202 : vector<8x128xf32>
    %204 = math.tanh %198 : vector<8x128xf32>
    %205 = arith.select %3, %203, %204 : vector<8x128xi1>, vector<8x128xf32>
    %206 = vector.extract_strided_slice %205 {offsets = [0, 0], sizes = [8, 32], strides = [1, 1]} : vector<8x128xf32> to vector<8x32xf32>
    %207 = vector.extract_strided_slice %205 {offsets = [0, 32], sizes = [8, 32], strides = [1, 1]} : vector<8x128xf32> to vector<8x32xf32>
    %208 = vector.extract_strided_slice %205 {offsets = [0, 64], sizes = [8, 32], strides = [1, 1]} : vector<8x128xf32> to vector<8x32xf32>
    %209 = vector.extract_strided_slice %205 {offsets = [0, 96], sizes = [8, 32], strides = [1, 1]} : vector<8x128xf32> to vector<8x32xf32>
    %210 = arith.mulf %206, %181 : vector<8x32xf32>
    %211 = arith.mulf %207, %209 : vector<8x32xf32>
    %212 = arith.addf %210, %211 : vector<8x32xf32>
    %213 = math.tanh %212 : vector<8x32xf32>
    %214 = arith.mulf %208, %213 : vector<8x32xf32>
    %c6_51 = arith.constant 6 : index
    %c0_52 = arith.constant 0 : index
    %c0_53 = arith.constant 0 : index
    %215 = vector.load %arg1[%c6_51, %c0_52, %c0_53] : memref<8x8x1xf32, #tpu.memory_space<vmem>>, vector<1x8x1xf32>
    %216 = vector.shape_cast %215 : vector<1x8x1xf32> to vector<8x1xf32>
    %217 = arith.subf %214, %189 : vector<8x32xf32>
    %218 = vector.broadcast %216 : vector<8x1xf32> to vector<8x32xf32>
    %219 = arith.mulf %218, %217 : vector<8x32xf32>
    %220 = arith.addf %189, %219 : vector<8x32xf32>
    %221 = vector.broadcast %216 : vector<8x1xf32> to vector<8x32xf32>
    %222 = arith.mulf %221, %220 : vector<8x32xf32>
    %223 = arith.addf %192, %222 : vector<8x32xf32>
    %224 = arith.addf %193, %216 : vector<8x1xf32>
    %c7 = arith.constant 7 : index
    %c0_54 = arith.constant 0 : index
    %c0_55 = arith.constant 0 : index
    %225 = vector.load %arg0[%c7, %c0_54, %c0_55] : memref<8x8x128xf32, #tpu.memory_space<vmem>>, vector<1x8x128xf32>
    %226 = vector.shape_cast %225 : vector<1x8x128xf32> to vector<8x128xf32>
    %227 = arith.truncf %220 : vector<8x32xf32> to vector<8x32xbf16>
    %cst_56 = arith.constant dense<0.000000e+00> : vector<8x128xf32>
    %228 = tpu.matmul %227, %0, %cst_56 {dimension_numbers = #tpu.dot_dimension_numbers<[1], [0], [0], [1], [0, 0, 1, 1], [], []>} : vector<8x32xbf16>, vector<32x128xbf16>, vector<8x128xf32> -> vector<8x128xf32>
    %229 = arith.addf %226, %228 : vector<8x128xf32>
    %230 = arith.negf %229 : vector<8x128xf32>
    %231 = math.exp %230 : vector<8x128xf32>
    %cst_57 = arith.constant 1.000000e+00 : f32
    %232 = vector.broadcast %cst_57 : f32 to vector<8x128xf32>
    %233 = arith.addf %232, %231 : vector<8x128xf32>
    %234 = arith.divf %232, %233 : vector<8x128xf32>
    %235 = math.tanh %229 : vector<8x128xf32>
    %236 = arith.select %3, %234, %235 : vector<8x128xi1>, vector<8x128xf32>
    %237 = vector.extract_strided_slice %236 {offsets = [0, 0], sizes = [8, 32], strides = [1, 1]} : vector<8x128xf32> to vector<8x32xf32>
    %238 = vector.extract_strided_slice %236 {offsets = [0, 32], sizes = [8, 32], strides = [1, 1]} : vector<8x128xf32> to vector<8x32xf32>
    %239 = vector.extract_strided_slice %236 {offsets = [0, 64], sizes = [8, 32], strides = [1, 1]} : vector<8x128xf32> to vector<8x32xf32>
    %240 = vector.extract_strided_slice %236 {offsets = [0, 96], sizes = [8, 32], strides = [1, 1]} : vector<8x128xf32> to vector<8x32xf32>
    %241 = arith.mulf %237, %212 : vector<8x32xf32>
    %242 = arith.mulf %238, %240 : vector<8x32xf32>
    %243 = arith.addf %241, %242 : vector<8x32xf32>
    %244 = math.tanh %243 : vector<8x32xf32>
    %245 = arith.mulf %239, %244 : vector<8x32xf32>
    %c7_58 = arith.constant 7 : index
    %c0_59 = arith.constant 0 : index
    %c0_60 = arith.constant 0 : index
    %246 = vector.load %arg1[%c7_58, %c0_59, %c0_60] : memref<8x8x1xf32, #tpu.memory_space<vmem>>, vector<1x8x1xf32>
    %247 = vector.shape_cast %246 : vector<1x8x1xf32> to vector<8x1xf32>
    %248 = arith.subf %245, %220 : vector<8x32xf32>
    %249 = vector.broadcast %247 : vector<8x1xf32> to vector<8x32xf32>
    %250 = arith.mulf %249, %248 : vector<8x32xf32>
    %251 = arith.addf %220, %250 : vector<8x32xf32>
    %252 = vector.broadcast %247 : vector<8x1xf32> to vector<8x32xf32>
    %253 = arith.mulf %252, %251 : vector<8x32xf32>
    %254 = arith.addf %223, %253 : vector<8x32xf32>
    %255 = arith.addf %224, %247 : vector<8x1xf32>
    %cst_61 = arith.constant 9.99999971E-10 : f32
    %256 = vector.broadcast %cst_61 : f32 to vector<8x1xf32>
    %257 = arith.maximumf %255, %256 : vector<8x1xf32>
    %258 = vector.broadcast %257 : vector<8x1xf32> to vector<8x32xf32>
    %259 = arith.divf %254, %258 : vector<8x32xf32>
    %260 = arith.truncf %259 : vector<8x32xf32> to vector<8x32xbf16>
    %c0_62 = arith.constant 0 : index
    %c0_63 = arith.constant 0 : index
    %261 = vector.load %arg3[%c0_62, %c0_63] : memref<32x128xbf16, #tpu.memory_space<vmem>>, vector<32x128xbf16>
    %cst_64 = arith.constant dense<0.000000e+00> : vector<8x128xf32>
    %262 = tpu.matmul %260, %261, %cst_64 {dimension_numbers = #tpu.dot_dimension_numbers<[1], [0], [0], [1], [0, 0, 1, 1], [], []>} : vector<8x32xbf16>, vector<32x128xbf16>, vector<8x128xf32> -> vector<8x128xf32>
    %c0_65 = arith.constant 0 : index
    %c0_66 = arith.constant 0 : index
    %263 = vector.load %arg4[%c0_65, %c0_66] : memref<1x128xf32, #tpu.memory_space<vmem>>, vector<1x128xf32>
    %264 = vector.broadcast %263 : vector<1x128xf32> to vector<8x128xf32>
    %265 = arith.addf %262, %264 : vector<8x128xf32>
    %c0_67 = arith.constant 0 : index
    %c0_68 = arith.constant 0 : index
    %266 = vector.load %arg5[%c0_67, %c0_68] : memref<8x128xf32, #tpu.memory_space<vmem>>, vector<8x128xf32>
    tpu.vector_store %arg5[%c0_67, %c0_68], %265 {strides = array<i32>} : memref<8x128xf32, #tpu.memory_space<vmem>>, vector<8x128xf32>,
    %c0_69 = arith.constant 0 : index
    %c0_70 = arith.constant 0 : index
    %267 = vector.load %arg6[%c0_69, %c0_70] : memref<8x32xf32, #tpu.memory_space<vmem>>, vector<8x32xf32>
    tpu.vector_store %arg6[%c0_69, %c0_70], %259 {strides = array<i32>} : memref<8x32xf32, #tpu.memory_space<vmem>>, vector<8x32xf32>,
    return
  }
}

</mosaic_0001>

<bundles_post_ra>
// kernel: manual_lstm_forward.1
= control target key start
LH: loop header
LB: loop body
LE: loop exit
PB: predicated region body
PF: predicated region fallthrough
CT: control target
= control target key end

     0   :  { %v1079_v1 = vmov 0.0   ;;  %vm1080_vm0 = vmmov 0   ;;  %v1081_v3 = vmov 0   ;;  %s1404_s0 = inlined_call_operand.vmem [shape: f32[8,8,128], index: 0, kind: input, shape index: {}]   ;;  %s1405_s1 = inlined_call_operand.vmem [shape: f32[8,8,1], index: 1, kind: input, shape index: {}]   ;;  %s1406_s2 = inlined_call_operand.vmem [shape: bf16[32,128], index: 2, kind: input, shape index: {}]   ;;  %s1407_s3 = inlined_call_operand.vmem [shape: bf16[32,128], index: 3, kind: input, shape index: {}]   ;;  %s1408_s4 = inlined_call_operand.vmem [shape: f32[1,128], index: 4, kind: input, shape index: {}]   ;;  %s1409_s5 = inlined_call_operand.vmem [shape: f32[8,128], index: 5, kind: output, shape index: {0}]   ;;  %s1410_s6 = inlined_call_operand.hbm [shape: f32[8,32], index: 6, kind: output, shape index: {1}]  }
   0x1   :  { %v1123_v0 = vld [vmem:[%s1406_s2] sm:$0xff]   ;;  %905 = vmatprep.subr.bf16.mxu0 %v1079_v1  ;;  %913 = vmatprep.subr.bf16.mxu1 %v1079_v1  ;;  %v1131_v2 = vld [vmem:[%s1406_s2 + $0x8] sm:$0xff]  }
   0x2   :  { %906 = vmatpush3.bf16.msra.mxu0 %v1123_v0  ;;  %909 = vmatprep.mubr.msk.bf16.mxu0 %vm1080_vm0, %v1079_v1 }
   0x3   :  { %907 = vmatprep.subr.bf16.mxu0 %v1079_v1  ;;  %983 = vset.pattern.permute.xlu1 %v1081_v3 }
   0x4   :  { %12 = vsyncpa [#allocation3], 0  ;;  %914 = vmatpush3.bf16.msra.mxu1 %v1123_v0  ;;  %917 = vmatprep.mubr.msk.bf16.mxu1 %vm1080_vm0, %v1079_v1  ;;  %v31_v4 = vld [vmem:[%s1404_s0] sm:$0xff]  ;;  %v28_v13 = vlaneseq  ;;  %s1082_s28 = smov 64   ;;  %s1083_s29 = smov 96   ;;  %vm44_vm2 = vcmask 261120  }
   0x5   :  { %915 = vmatprep.subr.bf16.mxu1 %v1079_v1  ;;  %984 = vset.pattern.permute.xlu0 %v1081_v3  ;;  %v1156_v14 = vld [vmem:[%s1405_s1] sm:$0xff]  ;;  %v846_v31 = vld [vmem:[%s1404_s0 + $0x8] sm:$0xff]  ;;  %v850_v58 = vld [vmem:[%s1404_s0 + $0x10] sm:$0xff] }
   0x6   :  { %908 = vmatpush3.bf16.msra.mxu0 %v1131_v2  ;;  %117 = vperm.xlu1 %983, %v1156_v14   ;;  %v1159_v15 = vand.u32 127, %v28_v13  ;;  %v849_v43 = vld [vmem:[%s1405_s1 + $0x8] sm:$0xff] }
   0x7   :  { %921 = vmatprep.subr.bf16.mxu0 %v1079_v1 }
   0x8   :  { %916 = vmatpush3.bf16.msra.mxu1 %v1131_v2  ;;  %vm30_vm1 = vcmp.lt.s32.totalorder %v1159_v15, 96  ;;  %v987_v15 = vld [vmem:[%s1407_s3] sm:$0xff]  }
   0x9   :  { %910 = vmatmul.mubr.bf16.vlgmr.msra.gmra.mrb[0].mxu0 %v1081_v3  ;;  %929 = vmatprep.subr.bf16.mxu1 %v1079_v1 }
   0xa   :  { %922 = vmatpush3.bf16.msra.mxu0 %v1123_v0  ;;  %925 = vmatprep.mubr.msk.bf16.mxu0 %vm1080_vm0, %v1079_v1 }
   0xb   :  { %923 = vmatprep.subr.bf16.mxu0 %v1079_v1 }
   0xe   :  { %924 = vmatpush3.bf16.msra.mxu0 %v1131_v2 }
   0xf   :  { %937 = vmatprep.subr.bf16.mxu0 %v1079_v1 }
  0x85   :  { %v1167_v25 = vpop.permute.xlu1 %117 }
  0xdc   :  { %v82_v5 = vpop.f32.mrb[0].mxu0 }
  0xdd   :  { %v88_v6 = vadd.f32 %v82_v5, %v31_v4  ;;  %v911_v7 = vpop.f32.mrb[1].mxu0 }
  0xde   :  { %v85_v8 = vpop.f32.mrb[2].mxu0 }
  0xdf   :  { %v845_v9 = vmul.f32 -1.442695, %v88_v6  ;;  %v912_v10 = vpop.f32.mrb[3].mxu0 }
  0xe0   :  { %v853_v10 = vld [vmem:[%s1405_s1 + $0x10] sm:$0xff] }
  0xe1   :  { %989 = vpow2.f32 %v845_v9  ;;  %v212_v9 = vadd.f32 %v849_v43, %v1156_v14 }
  0xe2   :  { %991 = vtanh.f32 %v88_v6 }
  0xeb   :  { %v990_v11 = vpop.eup %989 }
  0xec   :  { %v92_v12 = vadd.f32 1.0, %v990_v11  ;;  %v992_v16 = vpop.eup %991  ;;  %v1220_v11 = vadd.f32 %v853_v10, %v212_v9  ;;  %v1281_v9 = vld [vmem:[%s1405_s1 + $0x20] sm:$0xff] }
  0xee   :  { %993 = vrcp.f32 %v92_v12 }
  0xf8   :  { %v994_v17 = vpop.eup %993 }
  0xf9   :  { %v96_v18 = vsel %vm30_vm1, %v994_v17, %v992_v16 }
  0xfa   :  { %99 = vrot.lane.b32.xlu0 %v96_v18, %s1082_s28  ;;  %v97_v21 = vmul.f32 0.0, %v96_v18 }
 0x16c   :  { %v100_v19 = vpop.permute.xlu0 %99 }
 0x16d   :  { %v102_v20 = vmul.f32 %v100_v19, %v96_v18 }
 0x16f   :  { %104 = vrot.lane.b32.xlu0 %v102_v20, %s1083_s29 }
 0x1e1   :  { %v105_v22 = vpop.permute.xlu0 %104 }
 0x1e2   :  { %v107_v23 = vadd.f32 %v105_v22, %v97_v21 }
 0x1e4   :  { %995 = vtanh.f32 %v107_v23 }
 0x1ee   :  { %v996_v24 = vpop.eup %995 }
 0x1ef   :  { %110 = vrot.lane.b32.xlu1 %v996_v24, %s1082_s28 }
 0x261   :  { %v111_v26 = vpop.permute.xlu1 %110 }
 0x262   :  { %v113_v27 = vmul.f32 %v111_v26, %v96_v18 }
 0x264   :  { %v1170_v28 = vmul.f32 %v1167_v25, %v113_v27 }
 0x266   :  { %v127_v29 = vpack.c.bf16 %v1170_v28, %v1170_v28 }
 0x268   :  { %129 = vrot.lane.b32.xlu0 %v127_v29, %s1082_s28  ;;  %v854_v29 = vld [vmem:[%s1404_s0 + $0x18] sm:$0xff] }
 0x2da   :  { %v130_v30 = vpop.permute.xlu0 %129 }
 0x2db   :  { %918 = vmatmul.mubr.msk.bf16.vlgmr.msra.gmra.mrb[0].mxu1 %vm44_vm2, %v130_v30 }
 0x2dc   :  { %930 = vmatpush3.bf16.msra.mxu1 %v1123_v0  ;;  %933 = vmatprep.mubr.msk.bf16.mxu1 %vm1080_vm0, %v1079_v1 }
 0x2dd   :  { %931 = vmatprep.subr.bf16.mxu1 %v1079_v1 }
 0x2e0   :  { %932 = vmatpush3.bf16.msra.mxu1 %v1131_v2 }
 0x2e1   :  { %945 = vmatprep.subr.bf16.mxu1 %v1079_v1 }
 0x3ae   :  { %v168_v32 = vpop.f32.mrb[0].mxu1 }
 0x3af   :  { %v174_v33 = vadd.f32 %v846_v31, %v168_v32  ;;  %v919_v34 = vpop.f32.mrb[1].mxu1 }
 0x3b0   :  { %v171_v35 = vpop.f32.mrb[2].mxu1 }
 0x3b1   :  { %v848_v36 = vmul.f32 -1.442695, %v174_v33  ;;  %v920_v37 = vpop.f32.mrb[3].mxu1 }
 0x3b3   :  { %997 = vpow2.f32 %v848_v36 }
 0x3b4   :  { %999 = vtanh.f32 %v174_v33 }
 0x3bd   :  { %v998_v38 = vpop.eup %997 }
 0x3be   :  { %v178_v39 = vadd.f32 1.0, %v998_v38  ;;  %v1000_v40 = vpop.eup %999 }
 0x3c0   :  { %1001 = vrcp.f32 %v178_v39 }
 0x3ca   :  { %v1002_v41 = vpop.eup %1001 }
 0x3cb   :  { %v182_v42 = vsel %vm30_vm1, %v1002_v41, %v1000_v40  ;;  %v1250_v41 = vld [vmem:[%s1405_s1 + $0x18] sm:$0xff] }
 0x3cc   :  { %185 = vrot.lane.b32.xlu1 %v182_v42, %s1082_s28  ;;  %v183_v46 = vmul.f32 %v182_v42, %v107_v23 }
 0x3d0   :  { %205 = vperm.xlu1 %983, %v849_v43  }
 0x43e   :  { %v186_v44 = vpop.permute.xlu1 %185 }
 0x43f   :  { %v188_v45 = vmul.f32 %v186_v44, %v182_v42 }
 0x441   :  { %190 = vrot.lane.b32.xlu0 %v188_v45, %s1083_s29 }
 0x44f   :  { %v1194_v53 = vpop.permute.xlu1 %205 }
 0x4b3   :  { %v191_v47 = vpop.permute.xlu0 %190 }
 0x4b4   :  { %v193_v48 = vadd.f32 %v191_v47, %v183_v46 }
 0x4b6   :  { %1003 = vtanh.f32 %v193_v48 }
 0x4c0   :  { %v1004_v49 = vpop.eup %1003 }
 0x4c1   :  { %196 = vrot.lane.b32.xlu0 %v1004_v49, %s1082_s28 }
 0x533   :  { %v197_v50 = vpop.permute.xlu0 %196 }
 0x534   :  { %v199_v51 = vmul.f32 %v197_v50, %v182_v42 }
 0x536   :  { %v202_v52 = vsub.f32 %v199_v51, %v1170_v28 }
 0x538   :  { %v208_v54 = vmul.f32 %v1194_v53, %v202_v52 }
 0x53a   :  { %v1198_v55 = vadd.f32 %v208_v54, %v1170_v28 }
 0x53c   :  { %v215_v56 = vpack.c.bf16 %v1198_v55, %v1198_v55 }
 0x53e   :  { %217 = vrot.lane.b32.xlu1 %v215_v56, %s1082_s28 }
 0x5b0   :  { %v218_v57 = vpop.permute.xlu1 %217 }
 0x5b1   :  { %926 = vmatmul.mubr.msk.bf16.vlgmr.msra.gmra.mrb[4].mxu0 %vm44_vm2, %v218_v57 }
 0x5b2   :  { %938 = vmatpush3.bf16.msra.mxu0 %v1123_v0  ;;  %941 = vmatprep.mubr.msk.bf16.mxu0 %vm1080_vm0, %v1079_v1 }
 0x5b3   :  { %939 = vmatprep.subr.bf16.mxu0 %v1079_v1 }
 0x5b6   :  { %940 = vmatpush3.bf16.msra.mxu0 %v1131_v2 }
 0x5b7   :  { %953 = vmatprep.subr.bf16.mxu0 %v1079_v1 }
 0x684   :  { %v256_v59 = vpop.f32.mrb[4].mxu0 }
 0x685   :  { %v262_v60 = vadd.f32 %v850_v58, %v256_v59  ;;  %v927_v61 = vpop.f32.mrb[5].mxu0  ;;  %v858_v58 = vld [vmem:[%s1404_s0 + $0x20] sm:$0xff] }
 0x686   :  { %v259_v62 = vpop.f32.mrb[6].mxu0 }
 0x687   :  { %v852_v63 = vmul.f32 -1.442695, %v262_v60  ;;  %v928_v3 = vpop.f32.mrb[7].mxu0 }
 0x689   :  { %1005 = vpow2.f32 %v852_v63 }
 0x68a   :  { %1007 = vtanh.f32 %v262_v60 }
 0x693   :  { %v1006_v4 = vpop.eup %1005 }
 0x694   :  { %v266_v5 = vadd.f32 1.0, %v1006_v4  ;;  %v1008_v6 = vpop.eup %1007 }
 0x696   :  { %1009 = vrcp.f32 %v266_v5 }
 0x6a0   :  { %v1010_v7 = vpop.eup %1009 }
 0x6a1   :  { %v270_v8 = vsel %vm30_vm1, %v1010_v7, %v1008_v6 }
 0x6a2   :  { %273 = vrot.lane.b32.xlu0 %v270_v8, %s1082_s28  ;;  %v271_v16 = vmul.f32 %v270_v8, %v193_v48 }
 0x6a6   :  { %293 = vperm.xlu0 %984, %v853_v10  }
 0x714   :  { %v274_v12 = vpop.permute.xlu0 %273 }
 0x715   :  { %v276_v13 = vmul.f32 %v274_v12, %v270_v8 }
 0x717   :  { %278 = vrot.lane.b32.xlu1 %v276_v13, %s1083_s29 }
 0x725   :  { %v1224_v21 = vpop.permute.xlu0 %293 }
 0x789   :  { %v279_v17 = vpop.permute.xlu1 %278 }
 0x78a   :  { %v281_v18 = vadd.f32 %v279_v17, %v271_v16 }
 0x78c   :  { %1011 = vtanh.f32 %v281_v18 }
 0x796   :  { %v1012_v19 = vpop.eup %1011 }
 0x797   :  { %284 = vrot.lane.b32.xlu1 %v1012_v19, %s1082_s28 }
 0x809   :  { %v285_v20 = vpop.permute.xlu1 %284 }
 0x80a   :  { %v287_v14 = vmul.f32 %v285_v20, %v270_v8 }
 0x80c   :  { %v290_v22 = vsub.f32 %v287_v14, %v1198_v55 }
 0x80e   :  { %v296_v23 = vmul.f32 %v1224_v21, %v290_v22 }
 0x810   :  { %v1229_v24 = vadd.f32 %v296_v23, %v1198_v55 }
 0x812   :  { %v303_v26 = vpack.c.bf16 %v1229_v24, %v1229_v24 }
 0x814   :  { %305 = vrot.lane.b32.xlu1 %v303_v26, %s1082_s28 }
 0x886   :  { %v306_v27 = vpop.permute.xlu1 %305 }
 0x887   :  { %934 = vmatmul.mubr.msk.bf16.vlgmr.msra.gmra.mrb[4].mxu1 %vm44_vm2, %v306_v27 }
 0x888   :  { %946 = vmatpush3.bf16.msra.mxu1 %v1123_v0  ;;  %949 = vmatprep.mubr.msk.bf16.mxu1 %vm1080_vm0, %v1079_v1 }
 0x889   :  { %947 = vmatprep.subr.bf16.mxu1 %v1079_v1 }
 0x88c   :  { %948 = vmatpush3.bf16.msra.mxu1 %v1131_v2 }
 0x88d   :  { %961 = vmatprep.subr.bf16.mxu1 %v1079_v1 }
 0x95a   :  { %v344_v30 = vpop.f32.mrb[4].mxu1 }
 0x95b   :  { %v350_v31 = vadd.f32 %v854_v29, %v344_v30  ;;  %v935_v32 = vpop.f32.mrb[5].mxu1  ;;  %v862_v30 = vld [vmem:[%s1404_s0 + $0x28] sm:$0xff] }
 0x95c   :  { %v347_v33 = vpop.f32.mrb[6].mxu1 }
 0x95d   :  { %v856_v34 = vmul.f32 -1.442695, %v350_v31  ;;  %v936_v35 = vpop.f32.mrb[7].mxu1 }
 0x95f   :  { %1013 = vpow2.f32 %v856_v34 }
 0x960   :  { %1015 = vtanh.f32 %v350_v31 }
 0x969   :  { %v1014_v36 = vpop.eup %1013 }
 0x96a   :  { %v354_v37 = vadd.f32 1.0, %v1014_v36  ;;  %v1016_v38 = vpop.eup %1015 }
 0x96c   :  { %1017 = vrcp.f32 %v354_v37 }
 0x976   :  { %v1018_v39 = vpop.eup %1017 }
 0x977   :  { %v358_v40 = vsel %vm30_vm1, %v1018_v39, %v1016_v38 }
 0x978   :  { %361 = vrot.lane.b32.xlu0 %v358_v40, %s1082_s28  ;;  %v359_v44 = vmul.f32 %v358_v40, %v281_v18 }
 0x97c   :  { %381 = vperm.xlu0 %984, %v1250_v41  }
 0x9ea   :  { %v362_v42 = vpop.permute.xlu0 %361 }
 0x9eb   :  { %v364_v43 = vmul.f32 %v362_v42, %v358_v40 }
 0x9ed   :  { %366 = vrot.lane.b32.xlu1 %v364_v43, %s1083_s29 }
 0x9fb   :  { %v1256_v51 = vpop.permute.xlu0 %381 }
 0xa5f   :  { %v367_v45 = vpop.permute.xlu1 %366 }
 0xa60   :  { %v369_v46 = vadd.f32 %v367_v45, %v359_v44 }
 0xa62   :  { %1019 = vtanh.f32 %v369_v46 }
 0xa6c   :  { %v1020_v47 = vpop.eup %1019 }
 0xa6d   :  { %372 = vrot.lane.b32.xlu1 %v1020_v47, %s1082_s28 }
 0xadf   :  { %v373_v48 = vpop.permute.xlu1 %372 }
 0xae0   :  { %v375_v49 = vmul.f32 %v373_v48, %v358_v40  ;;  %v1311_v40 = vld [vmem:[%s1405_s1 + $0x28] sm:$0xff] }
 0xae2   :  { %v378_v50 = vsub.f32 %v375_v49, %v1229_v24 }
 0xae4   :  { %v384_v52 = vmul.f32 %v1256_v51, %v378_v50 }
 0xae6   :  { %v1260_v54 = vadd.f32 %v384_v52, %v1229_v24 }
 0xae8   :  { %v391_v56 = vpack.c.bf16 %v1260_v54, %v1260_v54 }
 0xaea   :  { %393 = vrot.lane.b32.xlu0 %v391_v56, %s1082_s28 }
 0xb5c   :  { %v394_v57 = vpop.permute.xlu0 %393 }
 0xb5d   :  { %942 = vmatmul.mubr.msk.bf16.vlgmr.msra.gmra.mrb[8].mxu0 %vm44_vm2, %v394_v57 }
 0xb5e   :  { %954 = vmatpush3.bf16.msra.mxu0 %v1123_v0  ;;  %957 = vmatprep.mubr.msk.bf16.mxu0 %vm1080_vm0, %v1079_v1 }
 0xb5f   :  { %955 = vmatprep.subr.bf16.mxu0 %v1079_v1 }
 0xb62   :  { %956 = vmatpush3.bf16.msra.mxu0 %v1131_v2 }
 0xb63   :  { %969 = vmatprep.subr.bf16.mxu0 %v1079_v1 }
 0xc30   :  { %v432_v59 = vpop.f32.mrb[8].mxu0 }
 0xc31   :  { %v438_v60 = vadd.f32 %v858_v58, %v432_v59  ;;  %v943_v61 = vpop.f32.mrb[9].mxu0 }
 0xc32   :  { %v435_v62 = vpop.f32.mrb[10].mxu0 }
 0xc33   :  { %v860_v63 = vmul.f32 -1.442695, %v438_v60  ;;  %v944_v3 = vpop.f32.mrb[11].mxu0 }
 0xc35   :  { %1021 = vpow2.f32 %v860_v63 }
 0xc36   :  { %1023 = vtanh.f32 %v438_v60  ;;  %v866_v60 = vld [vmem:[%s1404_s0 + $0x30] sm:$0xff] }
 0xc3f   :  { %v1022_v4 = vpop.eup %1021 }
 0xc40   :  { %v442_v5 = vadd.f32 1.0, %v1022_v4  ;;  %v1024_v6 = vpop.eup %1023 }
 0xc42   :  { %1025 = vrcp.f32 %v442_v5 }
 0xc4c   :  { %v1026_v7 = vpop.eup %1025 }
 0xc4d   :  { %v446_v8 = vsel %vm30_vm1, %v1026_v7, %v1024_v6 }
 0xc4e   :  { %449 = vrot.lane.b32.xlu1 %v446_v8, %s1082_s28  ;;  %v447_v13 = vmul.f32 %v446_v8, %v369_v46 }
 0xc52   :  { %469 = vperm.xlu1 %983, %v1281_v9  }
 0xcc0   :  { %v450_v10 = vpop.permute.xlu1 %449 }
 0xcc1   :  { %v452_v12 = vmul.f32 %v450_v10, %v446_v8 }
 0xcc3   :  { %454 = vrot.lane.b32.xlu0 %v452_v12, %s1083_s29 }
 0xcd1   :  { %v1287_v22 = vpop.permute.xlu1 %469 }
 0xd35   :  { %v455_v16 = vpop.permute.xlu0 %454 }
 0xd36   :  { %v457_v17 = vadd.f32 %v455_v16, %v447_v13  ;;  %v869_v13 = vld [vmem:[%s1405_s1 + $0x30] sm:$0xff] }
 0xd38   :  { %1027 = vtanh.f32 %v457_v17 }
 0xd42   :  { %v1028_v18 = vpop.eup %1027 }
 0xd43   :  { %460 = vrot.lane.b32.xlu0 %v1028_v18, %s1082_s28 }
 0xdb5   :  { %v461_v19 = vpop.permute.xlu0 %460 }
 0xdb6   :  { %v463_v20 = vmul.f32 %v461_v19, %v446_v8 }
 0xdb8   :  { %v466_v14 = vsub.f32 %v463_v20, %v1260_v54 }
 0xdba   :  { %v472_v23 = vmul.f32 %v1287_v22, %v466_v14 }
 0xdbc   :  { %v1291_v26 = vadd.f32 %v472_v23, %v1260_v54 }
 0xdbe   :  { %v479_v27 = vpack.c.bf16 %v1291_v26, %v1291_v26 }
 0xdc0   :  { %481 = vrot.lane.b32.xlu1 %v479_v27, %s1082_s28 }
 0xe32   :  { %v482_v29 = vpop.permute.xlu1 %481 }
 0xe33   :  { %950 = vmatmul.mubr.msk.bf16.vlgmr.msra.gmra.mrb[8].mxu1 %vm44_vm2, %v482_v29 }
 0xe34   :  { %962 = vmatpush3.bf16.msra.mxu1 %v1123_v0  ;;  %965 = vmatprep.mubr.msk.bf16.mxu1 %vm1080_vm0, %v1079_v1 }
 0xe35   :  { %963 = vmatprep.subr.bf16.mxu1 %v1079_v1 }
 0xe38   :  { %964 = vmatpush3.bf16.msra.mxu1 %v1131_v2 }
 0xf06   :  { %v520_v31 = vpop.f32.mrb[8].mxu1 }
 0xf07   :  { %v526_v32 = vadd.f32 %v862_v30, %v520_v31  ;;  %v951_v33 = vpop.f32.mrb[9].mxu1 }
 0xf08   :  { %v523_v34 = vpop.f32.mrb[10].mxu1 }
 0xf09   :  { %v864_v35 = vmul.f32 -1.442695, %v526_v32  ;;  %v952_v36 = vpop.f32.mrb[11].mxu1 }
 0xf0b   :  { %1029 = vpow2.f32 %v864_v35  ;;  %v870_v35 = vld [vmem:[%s1404_s0 + $0x38] sm:$0xff] }
 0xf0c   :  { %1031 = vtanh.f32 %v526_v32 }
 0xf15   :  { %v1030_v37 = vpop.eup %1029 }
 0xf16   :  { %v530_v0 = vadd.f32 1.0, %v1030_v37  ;;  %v1032_v38 = vpop.eup %1031 }
 0xf18   :  { %1033 = vrcp.f32 %v530_v0 }
 0xf22   :  { %v1034_v39 = vpop.eup %1033 }
 0xf23   :  { %v534_v2 = vsel %vm30_vm1, %v1034_v39, %v1032_v38 }
 0xf24   :  { %537 = vrot.lane.b32.xlu0 %v534_v2, %s1082_s28  ;;  %v535_v44 = vmul.f32 %v534_v2, %v457_v17 }
 0xf28   :  { %557 = vperm.xlu0 %984, %v1311_v40  }
 0xf96   :  { %v538_v42 = vpop.permute.xlu0 %537 }
 0xf97   :  { %v540_v43 = vmul.f32 %v538_v42, %v534_v2  ;;  %v388_v42 = vadd.f32 %v1250_v41, %v1220_v11 }
 0xf99   :  { %542 = vrot.lane.b32.xlu1 %v540_v43, %s1083_s29  ;;  %v476_v43 = vadd.f32 %v1281_v9, %v388_v42 }
 0xfa7   :  { %v1317_v52 = vpop.permute.xlu0 %557 }
0x100b   :  { %v543_v45 = vpop.permute.xlu1 %542 }
0x100c   :  { %v545_v46 = vadd.f32 %v543_v45, %v535_v44 }
0x100e   :  { %1035 = vtanh.f32 %v545_v46 }
0x1018   :  { %v1036_v47 = vpop.eup %1035 }
0x1019   :  { %548 = vrot.lane.b32.xlu1 %v1036_v47, %s1082_s28 }
0x108b   :  { %v549_v48 = vpop.permute.xlu1 %548 }
0x108c   :  { %v551_v49 = vmul.f32 %v549_v48, %v534_v2  ;;  %v873_v48 = vld [vmem:[%s1405_s1 + $0x38] sm:$0xff] }
0x108e   :  { %v554_v50 = vsub.f32 %v551_v49, %v1291_v26 }
0x1090   :  { %v560_v56 = vmul.f32 %v1317_v52, %v554_v50 }
0x1092   :  { %v1321_v57 = vadd.f32 %v560_v56, %v1291_v26 }
0x1094   :  { %v567_v58 = vpack.c.bf16 %v1321_v57, %v1321_v57 }
0x1096   :  { %569 = vrot.lane.b32.xlu0 %v567_v58, %s1082_s28 }
0x1108   :  { %v570_v59 = vpop.permute.xlu0 %569 }
0x1109   :  { %958 = vmatmul.mubr.msk.bf16.vlgmr.msra.gmra.mrb[12].mxu0 %vm44_vm2, %v570_v59 }
0x110a   :  { %973 = vmatprep.mubr.msk.bf16.mxu0 %vm1080_vm0, %v1079_v1  ;;  %970 = vmatpush3.bf16.msra.mxu0 %v987_v15 }
0x110b   :  { %971 = vmatprep.subr.bf16.mxu0 %v1079_v1  ;;  %v474_v1 = vmul.f32 %v1291_v26, %v1287_v22 }
0x11dc   :  { %v608_v61 = vpop.f32.mrb[12].mxu0 }
0x11dd   :  { %v614_v62 = vadd.f32 %v866_v60, %v608_v61  ;;  %v959_v63 = vpop.f32.mrb[13].mxu0 }
0x11de   :  { %v611_v3 = vpop.f32.mrb[14].mxu0  ;;  %v210_v63 = vmul.f32 %v1198_v55, %v1194_v53  ;;  %v562_v55 = vmul.f32 %v1321_v57, %v1317_v52 }
0x11df   :  { %v868_v4 = vmul.f32 -1.442695, %v614_v62  ;;  %v960_v5 = vpop.f32.mrb[15].mxu0 }
0x11e0   :  { %v298_v5 = vmul.f32 %v1229_v24, %v1224_v21 }
0x11e1   :  { %1037 = vpow2.f32 %v868_v4  ;;  %v122_v4 = vmul.f32 %v1170_v28, %v1167_v25 }
0x11e2   :  { %1039 = vtanh.f32 %v614_v62  ;;  %v988_v62 = vld [vmem:[%s1407_s3 + $0x8] sm:$0xff]   ;;  %s1084_s3 = smov [#allocation2]  }
0x11e3   :  { %972 = vmatpush3.bf16.msra.mxu0 %v988_v62 }
0x11eb   :  { %v1038_v6 = vpop.eup %1037 }
0x11ec   :  { %v618_v7 = vadd.f32 1.0, %v1038_v6  ;;  %v1040_v8 = vpop.eup %1039  ;;  %v211_v6 = vadd.f32 %v210_v63, %v122_v4 }
0x11ee   :  { %1041 = vrcp.f32 %v618_v7  ;;  %v386_v7 = vmul.f32 %v1260_v54, %v1256_v51 }
0x11f8   :  { %v1042_v10 = vpop.eup %1041 }
0x11f9   :  { %v622_v12 = vsel %vm30_vm1, %v1042_v10, %v1040_v8  ;;  %v299_v10 = vadd.f32 %v298_v5, %v211_v6 }
0x11fa   :  { %625 = vrot.lane.b32.xlu1 %v622_v12, %s1082_s28  ;;  %v623_v18 = vmul.f32 %v622_v12, %v545_v46  ;;  %v564_v46 = vadd.f32 %v1311_v40, %v476_v43 }
0x11fb   :  { %v387_v53 = vadd.f32 %v386_v7, %v299_v10 }
0x11fc   :  { %v652_v47 = vadd.f32 %v869_v13, %v564_v46 }
0x11fe   :  { %645 = vperm.xlu1 %983, %v869_v13   ;;  %v740_v49 = vadd.f32 %v873_v48, %v652_v47 }
0x1200   :  { %v741_v11 = vmax.f32 %v740_v49, 1e-09 }
0x126c   :  { %v626_v16 = vpop.permute.xlu1 %625 }
0x126d   :  { %v628_v17 = vmul.f32 %v626_v16, %v622_v12  ;;  %v475_v16 = vadd.f32 %v474_v1, %v387_v53 }
0x126f   :  { %630 = vrot.lane.b32.xlu0 %v628_v17, %s1083_s29  ;;  %v563_v17 = vadd.f32 %v562_v55, %v475_v16 }
0x127d   :  { %v1341_v30 = vpop.permute.xlu1 %645 }
0x12e1   :  { %v631_v19 = vpop.permute.xlu0 %630 }
0x12e2   :  { %v633_v20 = vadd.f32 %v631_v19, %v623_v18 }
0x12e4   :  { %1043 = vtanh.f32 %v633_v20 }
0x12ee   :  { %v1044_v14 = vpop.eup %1043 }
0x12ef   :  { %636 = vrot.lane.b32.xlu0 %v1044_v14, %s1082_s28 }
0x1361   :  { %v637_v23 = vpop.permute.xlu0 %636 }
0x1362   :  { %v639_v27 = vmul.f32 %v637_v23, %v622_v12 }
0x1364   :  { %v642_v29 = vsub.f32 %v639_v27, %v1321_v57 }
0x1366   :  { %v648_v31 = vmul.f32 %v1341_v30, %v642_v29 }
0x1368   :  { %v649_v32 = vadd.f32 %v648_v31, %v1321_v57 }
0x136a   :  { %v655_v33 = vpack.c.bf16 %v649_v32, %v649_v32  ;;  %v650_v21 = vmul.f32 %v649_v32, %v1341_v30 }
0x136c   :  { %657 = vrot.lane.b32.xlu1 %v655_v33, %s1082_s28  ;;  %v651_v51 = vadd.f32 %v650_v21, %v563_v17 }
0x13de   :  { %v658_v34 = vpop.permute.xlu1 %657 }
0x13df   :  { %966 = vmatmul.mubr.msk.bf16.vlgmr.msra.gmra.mrb[12].mxu1 %vm44_vm2, %v658_v34 }
0x14b2   :  { %v696_v36 = vpop.f32.mrb[12].mxu1 }
0x14b3   :  { %v702_v37 = vadd.f32 %v870_v35, %v696_v36  ;;  %v967_v0 = vpop.f32.mrb[13].mxu1 }
0x14b4   :  { %v699_v38 = vpop.f32.mrb[14].mxu1 }
0x14b5   :  { %v872_v39 = vmul.f32 -1.442695, %v702_v37  ;;  %v968_v2 = vpop.f32.mrb[15].mxu1 }
0x14b7   :  { %1045 = vpow2.f32 %v872_v39 }
0x14b8   :  { %1047 = vtanh.f32 %v702_v37 }
0x14c1   :  { %v1046_v44 = vpop.eup %1045 }
0x14c2   :  { %v706_v45 = vadd.f32 1.0, %v1046_v44  ;;  %v1048_v50 = vpop.eup %1047 }
0x14c4   :  { %1049 = vrcp.f32 %v706_v45 }
0x14ce   :  { %v1050_v56 = vpop.eup %1049 }
0x14cf   :  { %v710_v58 = vsel %vm30_vm1, %v1050_v56, %v1048_v50 }
0x14d0   :  { %713 = vrot.lane.b32.xlu0 %v710_v58, %s1082_s28  ;;  %v711_v40 = vmul.f32 %v710_v58, %v633_v20 }
0x14d4   :  { %744 = vperm.xlu0 %984, %v741_v11  }
0x1542   :  { %v714_v41 = vpop.permute.xlu0 %713 }
0x1543   :  { %v716_v9 = vmul.f32 %v714_v41, %v710_v58 }
0x1545   :  { %718 = vrot.lane.b32.xlu1 %v716_v9, %s1083_s29  ;;  %s833_s29 = sshll.u32 %s1084_s3, 4  ;;  %s834_s29 = int_to_ptr.vmem [resolvable:$true] %s833_s29 }
0x1546   :  { %s1055_s13 = scalar_lea.vmem %s834_s29, 128  ;;  %p1060_p1 = scmp.lt.s32.totalorder %s834_s29, %s834_s29 }
0x1547   :  { %p1056_p0 = scmp.ne.s32.totalorder %s834_s29, %s1055_s13  ;;  %p1061_p2 = scmp.lt.s32.totalorder %s1055_s13, %s1055_s13 }
0x1549   :  { %733 = vperm.xlu1 %983, %v873_v48   ;;  %p1062_p3 = por %p1061_p2, %p1060_p1 }
0x154b   :  { %p1063_p4 = pnand %p1062_p3, %p1056_p0 }
0x1553   :  { %v745_v3 = vpop.permute.xlu0 %744 }
0x15b7   :  { %v719_v59 = vpop.permute.xlu1 %718 }
0x15b8   :  { %v721_v60 = vadd.f32 %v719_v59, %v711_v40 }
0x15ba   :  { %1051 = vtanh.f32 %v721_v60 }
0x15bb   :  { %1053 = vrcp.f32 %v745_v3 }
0x15c4   :  { %v1052_v61 = vpop.eup %1051 }
0x15c5   :  { %724 = vrot.lane.b32.xlu0 %v1052_v61, %s1082_s28  ;;  %v1054_v19 = vpop.eup %1053 }
0x15c8   :  { %v734_v25 = vpop.permute.xlu1 %733 }
0x1637   :  { %v725_v8 = vpop.permute.xlu0 %724 }
0x1638   :  { %v727_v12 = vmul.f32 %v725_v8, %v710_v58 }
0x163a   :  { %v730_v13 = vsub.f32 %v727_v12, %v649_v32 }
0x163c   :  { %v736_v28 = vmul.f32 %v734_v25, %v730_v13 }
0x163e   :  { %v737_v24 = vadd.f32 %v736_v28, %v649_v32 }
0x1640   :  { %v738_v54 = vmul.f32 %v737_v24, %v734_v25 }
0x1642   :  { %v739_v18 = vadd.f32 %v738_v54, %v651_v51 }
0x1644   :  { %v748_v20 = vmul.f32 %v1054_v19, %v739_v18 }
0x1646   :  { %821 = vrot.lane.b32.xlu0 %v748_v20, %s1082_s28  ;;  %v749_v22 = vpack.c.bf16 %v748_v20, %v748_v20 }
0x1648   :  { %762 = vrot.lane.b32.xlu1 %v749_v22, %s1082_s28 }
0x16b8   :  { %v822_v26 = vpop.permute.xlu0 %821 }
0x16b9   :  { %824 = vst.msk [vmem:[#allocation2] sm:$0xff] %vm44_vm2, %v822_v26 }
0x16ba   :  { %v763_v52 = vpop.permute.xlu1 %762 }
0x16bb   :  { %974 = vmatmul.mubr.msk.bf16.vlgmr.msra.gmra.mrb[16].mxu0 %vm44_vm2, %v763_v52 }
0x16bc   :  { %1066 = shalt.err (!%p1063_p4)
}
0x16bd   :  { %s1067_s28 = scalar_lea.hbm %s1410_s6, 128 }
0x16be   :  { %p1068_p5 = scmp.ne.s32.totalorder %s1410_s6, %s1067_s28  ;;  %p1071_p6 = scmp.lt.u32.totalorder %s1067_s28, %s1410_s6 }
0x16c0   :  { %p1073_p7 = pnand %p1071_p6, %p1068_p5 }
0x16c2   :  { %1076 = shalt.err (!%p1073_p7)
}
0x16c3   :  { %836 = dma.vmem_to_hbm [thread:$0]  %s834_s29, 128, %s1410_s6, [#allocation3]   ;;  %v874_v57 = vld [vmem:[%s1408_s4] ss:$0 sm:$0xff] }
0x178e   :  { %v813_v14 = vpop.f32.mrb[16].mxu0 }
0x178f   :  { %v814_v23 = vadd.f32 %v874_v57, %v813_v14  ;;  %v975_v27 = vpop.f32.mrb[17].mxu0 }
0x1790   :  { %v816_v29 = vpop.f32.mrb[18].mxu0 }
0x1791   :  { %819 = vst [vmem:[%s1409_s5] sm:$0xff] %v814_v23  ;;  %v976_v30 = vpop.f32.mrb[19].mxu0 }
0x1792   :  { %1077 = dma.done.wait [#allocation3], 128  }
0x1793   :  { %1078 = vsyncadd [#allocation3], 4294967168 }
0x1794   :  { %842 = vsyncpa [#allocation3], 1 }

</bundles_post_ra>
